<compile_context>
chip_gen: v5e
topology: v5e:2x2
jax: 0.10.0
libtpu: 0.0.40
codegen_flags: <defaults>
</compile_context>

<pallas_src>
import functools

import jax
import jax.numpy as jnp
from jax.experimental import pallas as pl
from jax.experimental.pallas import tpu as pltpu

EPS = 0.003


def _round_up(x, m):
    return ((x + m - 1) // m) * m


def _actor_kernel(action_lim,
                  x_ref,
                  w1_ref, b1_ref,
                  w2_ref, b2_ref,
                  w3_ref, b3_ref,
                  w4_ref, b4_ref,
                  out_ref):
    # x / w1..w3 arrive as bf16 (pre-cast in the wrapper); matmuls accumulate
    # in f32, the bias-add is f32, and the hidden activations are repacked to
    # bf16 right after the bias-add so the ReLU and the next matmul operand
    # stay half-width (fewer live vregs, less VPU pack work).
    h = jnp.dot(x_ref[...], w1_ref[...],
                preferred_element_type=jnp.float32) + b1_ref[...]
    h = jnp.maximum(h.astype(jnp.bfloat16), 0.0)

    h = jnp.dot(h, w2_ref[...],
                preferred_element_type=jnp.float32) + b2_ref[...]
    h = jnp.maximum(h.astype(jnp.bfloat16), 0.0)

    h = jnp.dot(h, w3_ref[...],
                preferred_element_type=jnp.float32) + b3_ref[...]
    h = jnp.maximum(h, 0.0)            # stays f32: fc4 runs entirely in f32

    logits = jnp.dot(h, w4_ref[...],
                     preferred_element_type=jnp.float32) + b4_ref[...]
    action = jnp.tanh(logits) * jnp.float32(action_lim)

    out_ref[...] = action.astype(out_ref.dtype)


def actor_forward(state, params, action_lim, *, row_tile=1024):
    """Runs the Actor forward pass as one Pallas call with a batch grid.

    state:  [n, state_dim] float
    params: dict with w1..w4 ([in, out]) and b1..b4 ([1, out]), all float32
    """
    n, state_dim = state.shape
    action_dim = params["w4"].shape[1]

    # Rows are only padded to the 8-sublane granularity (<= 7 wasted rows);
    # the grid itself uses a partial last block via cdiv instead of padding
    # the batch up to a full tile.
    n_pad = _round_up(n, 8)
    tm = _round_up(min(row_tile, n_pad), 8)
    grid = (pl.cdiv(n_pad, tm),)

    x = state.astype(jnp.bfloat16)
    if n_pad != n:
        x = jnp.pad(x, ((0, n_pad - n), (0, 0)))

    # bf16 weights for fc1..fc3 (halved DMA bytes / resident VMEM); f32
    # biases; fc4 weight stays f32 for action precision.
    w1 = params["w1"].astype(jnp.bfloat16)
    w2 = params["w2"].astype(jnp.bfloat16)
    w3 = params["w3"].astype(jnp.bfloat16)
    weights = (w1, params["b1"], w2, params["b2"], w3, params["b3"],
               params["w4"], params["b4"])

    def resident(arr):
        # Full-array block with a constant index_map -> stays resident in
        # VMEM across all grid steps (no per-step re-DMA of weights).
        return pl.BlockSpec(arr.shape, lambda i: (0,) * arr.ndim)

    in_specs = [pl.BlockSpec((tm, state_dim), lambda i: (i, 0))]
    in_specs += [resident(a) for a in weights]
    out_spec = pl.BlockSpec((tm, action_dim), lambda i: (i, 0))

    flops = 2 * n_pad * (state_dim * 256 + 256 * 128 + 128 * 64
                         + 64 * action_dim)
    bytes_accessed = int(
        x.size * 2                                    # bf16 input rows
        + (w1.size + w2.size + w3.size) * 2           # bf16 weights
        + 4 * (params["w4"].size + params["b1"].size + params["b2"].size
               + params["b3"].size + params["b4"].size)
        + n_pad * action_dim * 4)                     # f32 output rows
    cost = pl.CostEstimate(flops=flops,
                           transcendentals=n_pad * action_dim,
                           bytes_accessed=bytes_accessed)

    # TODO(synk): action_lim is baked in as a compile-time constant; pass it
    # via SMEM if it ever needs to vary without recompilation.
    kernel = functools.partial(_actor_kernel, float(action_lim))

    def call(dim_semantics):
        return pl.pallas_call(
            kernel,
            out_shape=jax.ShapeDtypeStruct((n_pad, action_dim), jnp.float32),
            grid=grid,
            in_specs=in_specs,
            out_specs=out_spec,
            compiler_params=pltpu.CompilerParams(
                dimension_semantics=dim_semantics,
                vmem_limit_bytes=32 << 20),
            cost_estimate=cost,
        )(x, *weights)

    # v7x has 2 TensorCores per chip and only CORE_PARALLEL actually shards
    # the batch grid across them (plain "parallel" does not change codegen);
    # on 1-TC v5e/v6e the two are equivalent.  Try CORE_PARALLEL when there
    # is more than one grid step and fall back if it is rejected.
    options = []
    core_parallel = getattr(pltpu, "CORE_PARALLEL", None)
    if core_parallel is not None and grid[0] > 1:
        options.append((core_parallel,))
    options.append(("parallel",))

    out = None
    last_err = None
    for sem in options:
        try:
            out = call(sem)
            break
        except Exception as err:  # lowering rejected this dimension semantics
            last_err = err
    if out is None:
        raise last_err

    return out if n_pad == n else out[:n]


def init_actor_params(key, state_dim, action_dim):
    """Deterministic init mirroring the PyTorch module's __init__ shapes.

    fanin_init: U(-1/sqrt(fan_in), 1/sqrt(fan_in)) on the weight.
    fc4 weight: U(-EPS, EPS). Biases: U(-1/sqrt(fan_in), 1/sqrt(fan_in))
    (PyTorch Linear default). Weights stored as [in, out] (transposed).
    """
    dims = [(state_dim, 256), (256, 128), (128, 64), (64, action_dim)]
    keys = jax.random.split(key, 8)
    params = {}
    for i, (fan_in, fan_out) in enumerate(dims, start=1):
        bound = EPS if i == 4 else 1.0 / jnp.sqrt(jnp.float32(fan_in))
        b_bound = 1.0 / jnp.sqrt(jnp.float32(fan_in))
        params[f"w{i}"] = jax.random.uniform(
            keys[2 * (i - 1)], (fan_in, fan_out),
            minval=-bound, maxval=bound, dtype=jnp.float32)
        params[f"b{i}"] = jax.random.uniform(
            keys[2 * (i - 1) + 1], (1, fan_out),
            minval=-b_bound, maxval=b_bound, dtype=jnp.float32)
    return params


def actor_reference(state, params, action_lim):
    x = jnp.maximum(state @ params["w1"] + params["b1"], 0.0)
    x = jnp.maximum(x @ params["w2"] + params["b2"], 0.0)
    x = jnp.maximum(x @ params["w3"] + params["b3"], 0.0)
    return jnp.tanh(x @ params["w4"] + params["b4"]) * action_lim


if __name__ == "__main__":
    key = jax.random.PRNGKey(0)
    k_param, k_state = jax.random.split(key)

    state_dim = 32
    action_dim = 4
    action_lim = 2.0
    params = init_actor_params(k_param, state_dim, action_dim)

    # Small batch: single grid step.
    state = jax.random.normal(k_state, (8, state_dim), dtype=jnp.float32)
    out = jax.block_until_ready(actor_forward(state, params, action_lim))
    ref = actor_reference(state, params, action_lim)
    assert out.shape == (8, action_dim)
    # bf16 matmul inputs on fc1..fc3 (f32 accumulation, f32 fc4) -> slightly
    # looser tolerance than a pure-f32 path.
    assert jnp.allclose(out, ref, atol=1e-2, rtol=1e-2), "mismatch (small)"

    # Larger, non-tile-aligned batch: exercises the multi-step grid, the
    # partial last block, and CORE_PARALLEL on 2-TC chips.
    state_big = jax.random.normal(jax.random.PRNGKey(1), (300, state_dim),
                                  dtype=jnp.float32)
    out_big = jax.block_until_ready(
        actor_forward(state_big, params, action_lim, row_tile=128))
    ref_big = actor_reference(state_big, params, action_lim)
    assert out_big.shape == (300, action_dim)
    assert jnp.allclose(out_big, ref_big, atol=1e-2, rtol=1e-2), "mismatch (big)"

    print("KERNEL_OK")
</pallas_src>

<mosaic_0001>
module attributes {stable_mosaic.version = 11 : i64} {
  func.func @_actor_kernel(%arg0: i32, %arg1: memref<8x32xbf16, #tpu.memory_space<vmem>>, %arg2: memref<32x256xbf16, #tpu.memory_space<vmem>>, %arg3: memref<1x256xf32, #tpu.memory_space<vmem>>, %arg4: memref<256x128xbf16, #tpu.memory_space<vmem>>, %arg5: memref<1x128xf32, #tpu.memory_space<vmem>>, %arg6: memref<128x64xbf16, #tpu.memory_space<vmem>>, %arg7: memref<1x64xf32, #tpu.memory_space<vmem>>, %arg8: memref<64x4xf32, #tpu.memory_space<vmem>>, %arg9: memref<1x4xf32, #tpu.memory_space<vmem>>, %arg10: memref<8x4xf32, #tpu.memory_space<vmem>>) attributes {dimension_semantics = [#tpu.dimension_semantics<parallel>], iteration_bounds = array<i64: 1>, scalar_prefetch = 0 : i64, scratch_operands = 0 : i64, tpu.core_type = #tpu.core_type<tc>, window_params = [{transform_indices = @transform_0, window_bounds = array<i64: 8, 32>}, {pipeline_mode = #tpu.pipeline_mode<synchronous>, transform_indices = @transform_1, window_bounds = array<i64: 32, 256>}, {pipeline_mode = #tpu.pipeline_mode<synchronous>, transform_indices = @transform_2, window_bounds = array<i64: 1, 256>}, {pipeline_mode = #tpu.pipeline_mode<synchronous>, transform_indices = @transform_3, window_bounds = array<i64: 256, 128>}, {pipeline_mode = #tpu.pipeline_mode<synchronous>, transform_indices = @transform_4, window_bounds = array<i64: 1, 128>}, {pipeline_mode = #tpu.pipeline_mode<synchronous>, transform_indices = @transform_5, window_bounds = array<i64: 128, 64>}, {pipeline_mode = #tpu.pipeline_mode<synchronous>, transform_indices = @transform_6, window_bounds = array<i64: 1, 64>}, {pipeline_mode = #tpu.pipeline_mode<synchronous>, transform_indices = @transform_7, window_bounds = array<i64: 64, 4>}, {pipeline_mode = #tpu.pipeline_mode<synchronous>, transform_indices = @transform_8, window_bounds = array<i64: 1, 4>}, {transform_indices = @transform_9, window_bounds = array<i64: 8, 4>}]} {
    %c0 = arith.constant 0 : index
    %c0_0 = arith.constant 0 : index
    %0 = vector.load %arg1[%c0, %c0_0] : memref<8x32xbf16, #tpu.memory_space<vmem>>, vector<8x32xbf16>
    %c0_1 = arith.constant 0 : index
    %c0_2 = arith.constant 0 : index
    %1 = vector.load %arg2[%c0_1, %c0_2] : memref<32x256xbf16, #tpu.memory_space<vmem>>, vector<32x256xbf16>
    %cst = arith.constant dense<0.000000e+00> : vector<8x256xf32>
    %2 = tpu.matmul %0, %1, %cst {dimension_numbers = #tpu.dot_dimension_numbers<[1], [0], [0], [1], [0, 0, 1, 1], [], []>} : vector<8x32xbf16>, vector<32x256xbf16>, vector<8x256xf32> -> vector<8x256xf32>
    %c0_3 = arith.constant 0 : index
    %c0_4 = arith.constant 0 : index
    %3 = vector.load %arg3[%c0_3, %c0_4] : memref<1x256xf32, #tpu.memory_space<vmem>>, vector<1x256xf32>
    %4 = vector.broadcast %3 : vector<1x256xf32> to vector<8x256xf32>
    %5 = arith.addf %2, %4 : vector<8x256xf32>
    %6 = arith.truncf %5 : vector<8x256xf32> to vector<8x256xbf16>
    %cst_5 = arith.constant 0.000000e+00 : bf16
    %7 = vector.broadcast %cst_5 : bf16 to vector<8x256xbf16>
    %8 = arith.maximumf %6, %7 : vector<8x256xbf16>
    %c0_6 = arith.constant 0 : index
    %c0_7 = arith.constant 0 : index
    %9 = vector.load %arg4[%c0_6, %c0_7] : memref<256x128xbf16, #tpu.memory_space<vmem>>, vector<256x128xbf16>
    %cst_8 = arith.constant dense<0.000000e+00> : vector<8x128xf32>
    %10 = tpu.matmul %8, %9, %cst_8 {dimension_numbers = #tpu.dot_dimension_numbers<[1], [0], [0], [1], [0, 0, 1, 1], [], []>} : vector<8x256xbf16>, vector<256x128xbf16>, vector<8x128xf32> -> vector<8x128xf32>
    %c0_9 = arith.constant 0 : index
    %c0_10 = arith.constant 0 : index
    %11 = vector.load %arg5[%c0_9, %c0_10] : memref<1x128xf32, #tpu.memory_space<vmem>>, vector<1x128xf32>
    %12 = vector.broadcast %11 : vector<1x128xf32> to vector<8x128xf32>
    %13 = arith.addf %10, %12 : vector<8x128xf32>
    %14 = arith.truncf %13 : vector<8x128xf32> to vector<8x128xbf16>
    %cst_11 = arith.constant 0.000000e+00 : bf16
    %15 = vector.broadcast %cst_11 : bf16 to vector<8x128xbf16>
    %16 = arith.maximumf %14, %15 : vector<8x128xbf16>
    %c0_12 = arith.constant 0 : index
    %c0_13 = arith.constant 0 : index
    %17 = vector.load %arg6[%c0_12, %c0_13] : memref<128x64xbf16, #tpu.memory_space<vmem>>, vector<128x64xbf16>
    %cst_14 = arith.constant dense<0.000000e+00> : vector<8x64xf32>
    %18 = tpu.matmul %16, %17, %cst_14 {dimension_numbers = #tpu.dot_dimension_numbers<[1], [0], [0], [1], [0, 0, 1, 1], [], []>} : vector<8x128xbf16>, vector<128x64xbf16>, vector<8x64xf32> -> vector<8x64xf32>
    %c0_15 = arith.constant 0 : index
    %c0_16 = arith.constant 0 : index
    %19 = vector.load %arg7[%c0_15, %c0_16] : memref<1x64xf32, #tpu.memory_space<vmem>>, vector<1x64xf32>
    %20 = vector.broadcast %19 : vector<1x64xf32> to vector<8x64xf32>
    %21 = arith.addf %18, %20 : vector<8x64xf32>
    %cst_17 = arith.constant 0.000000e+00 : f32
    %22 = vector.broadcast %cst_17 : f32 to vector<8x64xf32>
    %23 = arith.maximumf %21, %22 : vector<8x64xf32>
    %c0_18 = arith.constant 0 : index
    %c0_19 = arith.constant 0 : index
    %24 = vector.load %arg8[%c0_18, %c0_19] : memref<64x4xf32, #tpu.memory_space<vmem>>, vector<64x4xf32>
    %cst_20 = arith.constant dense<0.000000e+00> : vector<8x4xf32>
    %25 = tpu.matmul %23, %24, %cst_20 {dimension_numbers = #tpu.dot_dimension_numbers<[1], [0], [0], [1], [0, 0, 1, 1], [], []>} : vector<8x64xf32>, vector<64x4xf32>, vector<8x4xf32> -> vector<8x4xf32>
    %c0_21 = arith.constant 0 : index
    %c0_22 = arith.constant 0 : index
    %26 = vector.load %arg9[%c0_21, %c0_22] : memref<1x4xf32, #tpu.memory_space<vmem>>, vector<1x4xf32>
    %27 = vector.broadcast %26 : vector<1x4xf32> to vector<8x4xf32>
    %28 = arith.addf %25, %27 : vector<8x4xf32>
    %29 = math.tanh %28 : vector<8x4xf32>
    %cst_23 = arith.constant 2.000000e+00 : f32
    %30 = vector.broadcast %cst_23 : f32 to vector<8x4xf32>
    %31 = arith.mulf %29, %30 : vector<8x4xf32>
    %c0_24 = arith.constant 0 : index
    %c0_25 = arith.constant 0 : index
    %32 = vector.load %arg10[%c0_24, %c0_25] : memref<8x4xf32, #tpu.memory_space<vmem>>, vector<8x4xf32>
    tpu.vector_store %arg10[%c0_24, %c0_25], %31 {strides = array<i32>} : memref<8x4xf32, #tpu.memory_space<vmem>>, vector<8x4xf32>,
    return
  }
  func.func @transform_0(%arg0: i32) -> (i32, i32) {
    %c0_i32 = arith.constant 0 : i32
    %c0_i32_0 = arith.constant 0 : i32
    return %arg0, %c0_i32 : i32, i32
  }
  func.func @transform_1(%arg0: i32) -> (i32, i32) {
    %c0_i32 = arith.constant 0 : i32
    %c0_i32_0 = arith.constant 0 : i32
    %c0_i32_1 = arith.constant 0 : i32
    return %c0_i32, %c0_i32_0 : i32, i32
  }
  func.func @transform_2(%arg0: i32) -> (i32, i32) {
    %c0_i32 = arith.constant 0 : i32
    %c0_i32_0 = arith.constant 0 : i32
    %c0_i32_1 = arith.constant 0 : i32
    return %c0_i32, %c0_i32_0 : i32, i32
  }
  func.func @transform_3(%arg0: i32) -> (i32, i32) {
    %c0_i32 = arith.constant 0 : i32
    %c0_i32_0 = arith.constant 0 : i32
    %c0_i32_1 = arith.constant 0 : i32
    return %c0_i32, %c0_i32_0 : i32, i32
  }
  func.func @transform_4(%arg0: i32) -> (i32, i32) {
    %c0_i32 = arith.constant 0 : i32
    %c0_i32_0 = arith.constant 0 : i32
    %c0_i32_1 = arith.constant 0 : i32
    return %c0_i32, %c0_i32_0 : i32, i32
  }
  func.func @transform_5(%arg0: i32) -> (i32, i32) {
    %c0_i32 = arith.constant 0 : i32
    %c0_i32_0 = arith.constant 0 : i32
    %c0_i32_1 = arith.constant 0 : i32
    return %c0_i32, %c0_i32_0 : i32, i32
  }
  func.func @transform_6(%arg0: i32) -> (i32, i32) {
    %c0_i32 = arith.constant 0 : i32
    %c0_i32_0 = arith.constant 0 : i32
    %c0_i32_1 = arith.constant 0 : i32
    return %c0_i32, %c0_i32_0 : i32, i32
  }
  func.func @transform_7(%arg0: i32) -> (i32, i32) {
    %c0_i32 = arith.constant 0 : i32
    %c0_i32_0 = arith.constant 0 : i32
    %c0_i32_1 = arith.constant 0 : i32
    return %c0_i32, %c0_i32_0 : i32, i32
  }
  func.func @transform_8(%arg0: i32) -> (i32, i32) {
    %c0_i32 = arith.constant 0 : i32
    %c0_i32_0 = arith.constant 0 : i32
    %c0_i32_1 = arith.constant 0 : i32
    return %c0_i32, %c0_i32_0 : i32, i32
  }
  func.func @transform_9(%arg0: i32) -> (i32, i32) {
    %c0_i32 = arith.constant 0 : i32
    %c0_i32_0 = arith.constant 0 : i32
    return %arg0, %c0_i32 : i32, i32
  }
}

</mosaic_0001>

<bundles_post_ra>
// kernel: tpu_custom_call.1
= control target key start
LH: loop header
LB: loop body
LE: loop exit
PB: predicated region body
PF: predicated region fallthrough
CT: control target
= control target key end

     0   :  { %14 = vsyncpa [#allocation3], 0  ;;  %s579_s12 = smov [#allocation2]   ;;  %s768_s0 = inlined_call_operand.hbm [shape: bf16[8,32], index: 0, kind: input, shape index: {}]   ;;  %s769_s1 = inlined_call_operand.vmem [shape: bf16[32,256], index: 1, kind: input, shape index: {}]   ;;  %s770_s2 = inlined_call_operand.vmem [shape: f32[1,256], index: 2, kind: input, shape index: {}]   ;;  %s771_s3 = inlined_call_operand.vmem [shape: bf16[256,128], index: 3, kind: input, shape index: {}]   ;;  %s772_s4 = inlined_call_operand.vmem [shape: f32[1,128], index: 4, kind: input, shape index: {}]   ;;  %s773_s5 = inlined_call_operand.vmem [shape: bf16[128,64], index: 5, kind: input, shape index: {}]   ;;  %s774_s6 = inlined_call_operand.vmem [shape: f32[1,64], index: 6, kind: input, shape index: {}]   ;;  %s775_s7 = inlined_call_operand.vmem [shape: f32[64,4], index: 7, kind: input, shape index: {}]   ;;  %s776_s8 = inlined_call_operand.vmem [shape: f32[1,4], index: 8, kind: input, shape index: {}]   ;;  %s777_s9 = inlined_call_operand.vmem [shape: f32[8,4], index: 9, kind: output, shape index: {}]  }
   0x1   :  { %s20_s11 = sshll.u32 %s768_s0, 4  ;;  %s22_s13 = sshll.u32 %s579_s12, 4  ;;  %s21_s11 = int_to_ptr.hbm [resolvable:$true] %s20_s11  ;;  %s23_s13 = int_to_ptr.vmem [resolvable:$true] %s22_s13 }
   0x2   :  { %25 = dma.hbm_to_vmem [thread:$0]  %s21_s11, 64, %s23_s13, [#allocation3]  }
   0x3   :  { %577 = dma.done.wait [#allocation3], 64  }
   0x4   :  { %578 = vsyncadd [#allocation3], 4294967232  ;;  %v414_v0 = vld [vmem:[%s769_s1 + $0x10] sm:$0xf]  ;;  %v522_v1 = vld [vmem:[%s769_s1 + $0x14] sm:$0xf0] }
   0x5   :  { %v406_v2 = vld [vmem:[%s769_s1] sm:$0xf]  ;;  %v415_v3 = vor.u32 %v522_v1, %v414_v0  ;;  %v520_v4 = vld [vmem:[%s769_s1 + $0x4] sm:$0xf0]  ;;  %v521_v5 = vld [vmem:[%s769_s1 + $0x14] sm:$0xf] }
   0x6   :  { %v416_v6 = vld [vmem:[%s769_s1 + $0x18] sm:$0xf0]  ;;  %v407_v7 = vor.u32 %v520_v4, %v406_v2  ;;  %v519_v11 = vld [vmem:[%s769_s1 + $0x4] sm:$0xf]  ;;  %v408_v12 = vld [vmem:[%s769_s1 + $0x8] sm:$0xf0] }
   0x7   :  { %88 = vmatpush.bf16.msra.mxu1 %v415_v3  ;;  %v530_v8 = vld [vmem:[%s771_s3 + $0x38] sm:$0xff]  ;;  %v419_v9 = vor.u32 %v521_v5, %v416_v6  ;;  %v529_v13 = vld [vmem:[%s771_s3 + $0x30] sm:$0xff]  ;;  %v47_v15 = vld [vmem:[#allocation2] sm:$0xf]  ;;  %vm78_vm0 = vcmask 261120   ;;  %v411_v16 = vor.u32 %v519_v11, %v408_v12  ;;  %vm371_vm1 = vcmask 523264  }
   0x8   :  { %v538_v10 = vld [vmem:[%s771_s3 + $0x78] sm:$0xff]  ;;  %247 = vmatpush.bf16.msra.mxu2 %v530_v8  ;;  %v537_v14 = vld [vmem:[%s771_s3 + $0x70] sm:$0xff]  ;;  %v528_v17 = vld [vmem:[%s771_s3 + $0x28] sm:$0xff]  ;;  %vm397_vm2 = vcmask 31744  }
   0x9   :  { %260 = vmatpush.bf16.msra.mxu3 %v538_v10  ;;  %v527_v18 = vld [vmem:[%s771_s3 + $0x20] sm:$0xff]  ;;  %v526_v19 = vld [vmem:[%s771_s3 + $0x18] sm:$0xff]  ;;  %v525_v20 = vld [vmem:[%s771_s3 + $0x10] sm:$0xff] }
   0xa   :  { %v524_v21 = vld [vmem:[%s771_s3 + $0x8] sm:$0xff]  ;;  %v523_v23 = vld [vmem:[%s771_s3] sm:$0xff]  ;;  %v534_v25 = vld [vmem:[%s771_s3 + $0x58] sm:$0xff] }
   0xb   :  { %89 = vmatpush.bf16.msra.mxu1 %v407_v7  ;;  %v536_v22 = vld [vmem:[%s771_s3 + $0x68] sm:$0xff]  ;;  %v535_v24 = vld [vmem:[%s771_s3 + $0x60] sm:$0xff]  ;;  %v533_v26 = vld [vmem:[%s771_s3 + $0x50] sm:$0xff] }
   0xc   :  { %248 = vmatpush.bf16.msra.mxu2 %v529_v13  ;;  %v532_v27 = vld [vmem:[%s771_s3 + $0x48] sm:$0xff]  ;;  %v531_v28 = vld [vmem:[%s771_s3 + $0x40] sm:$0xff]  ;;  %v546_v29 = vld [vmem:[%s773_s5 + $0x38] sm:$0xff] }
   0xd   :  { %261 = vmatpush.bf16.msra.mxu3 %v537_v14  ;;  %v52_v30 = vld [vmem:[%s770_s2] sm:$0x3]  ;;  %345 = vmatpush.bf16.msra.mxu0 %v546_v29  ;;  %v545_v31 = vld [vmem:[%s773_s5 + $0x30] sm:$0xff]  ;;  %v544_v44 = vld [vmem:[%s773_s5 + $0x28] sm:$0xff] }
   0xe   :  { %420 = vmatmul.msk.bf16.vlgmr.msra.gmra.mxu1 %vm78_vm0, %v47_v15  ;;  %v54_v32 = vperm.slane %v52_v30, 0  ;;  %v55_v38 = vperm.slane %v52_v30, 1  ;;  %v543_v45 = vld [vmem:[%s773_s5 + $0x20] sm:$0xff]  ;;  %v542_v46 = vld [vmem:[%s773_s5 + $0x18] sm:$0xff]  ;;  %v541_v47 = vld [vmem:[%s773_s5 + $0x10] sm:$0xff] }
   0xf   :  { %101 = vmatpush.bf16.msrb.mxu1 %v419_v9  ;;  %v540_v48 = vld [vmem:[%s773_s5 + $0x8] sm:$0xff]  ;;  %v539_v49 = vld [vmem:[%s773_s5] sm:$0xff]  ;;  %v366_v50 = vld [vmem:[%s775_s7 + $0x38] sm:$0xff] }
  0x10   :  { %249 = vmatpush.bf16.msra.mxu2 %v528_v17  ;;  %v365_v51 = vld [vmem:[%s775_s7 + $0x30] sm:$0xff]  ;;  %v364_v52 = vld [vmem:[%s775_s7 + $0x28] sm:$0xff]  ;;  %v363_v53 = vld [vmem:[%s775_s7 + $0x20] sm:$0xff] }
  0x11   :  { %262 = vmatpush.bf16.msra.mxu3 %v536_v22  ;;  %346 = vmatpush.bf16.msra.mxu0 %v545_v31  ;;  %v362_v54 = vld [vmem:[%s775_s7 + $0x18] sm:$0xff]  ;;  %v361_v56 = vld [vmem:[%s775_s7 + $0x10] sm:$0xff]  ;;  %v548_v58 = vld [vmem:[%s772_s4] ss:$0 sm:$0xff] }
  0x12   :  { %v360_v1 = vld [vmem:[%s775_s7 + $0x8] sm:$0xff]  ;;  %v359_v2 = vld [vmem:[%s775_s7] sm:$0xff] }
  0x13   :  { %102 = vmatpush.bf16.msrb.mxu1 %v411_v16  ;;  %v549_v3 = vld [vmem:[%s774_s6] ss:$0 sm:$0xff] }
  0x14   :  { %250 = vmatpush.bf16.msra.mxu2 %v527_v18  ;;  %v550_v8 = vld [vmem:[%s776_s8] ss:$0 sm:$0xff] }
  0x15   :  { %263 = vmatpush.bf16.msra.mxu3 %v535_v24  ;;  %347 = vmatpush.bf16.msra.mxu0 %v544_v44 }
  0x17   :  { %383 = vmatpush.msra.mxu1 %v366_v50 }
  0x18   :  { %251 = vmatpush.bf16.msra.mxu2 %v526_v19 }
  0x19   :  { %264 = vmatpush.bf16.msra.mxu3 %v534_v25  ;;  %348 = vmatpush.bf16.msra.mxu0 %v543_v45 }
  0x1a   :  { %384 = vmatpush.msra.mxu1 %v365_v51 }
  0x1c   :  { %252 = vmatpush.bf16.msra.mxu2 %v525_v20  ;;  %385 = vmatpush.msra.mxu1 %v364_v52 }
  0x1d   :  { %265 = vmatpush.bf16.msra.mxu3 %v533_v26  ;;  %349 = vmatpush.bf16.msra.mxu0 %v542_v46 }
  0x1e   :  { %421 = vmatmul.msk.bf16.vlgmr.msrb.gmra.mxu1 %vm78_vm0, %v47_v15 }
  0x1f   :  { %386 = vmatpush.msra.mxu1 %v363_v53 }
  0x20   :  { %253 = vmatpush.bf16.msra.mxu2 %v524_v21 }
  0x21   :  { %266 = vmatpush.bf16.msra.mxu3 %v532_v27  ;;  %350 = vmatpush.bf16.msra.mxu0 %v541_v47 }
  0x22   :  { %387 = vmatpush.msra.mxu1 %v362_v54 }
  0x24   :  { %254 = vmatpush.bf16.msra.mxu2 %v523_v23  ;;  %388 = vmatpush.msra.mxu1 %v361_v56 }
  0x25   :  { %267 = vmatpush.bf16.msra.mxu3 %v531_v28  ;;  %351 = vmatpush.bf16.msra.mxu0 %v540_v48 }
  0x26   :  { %389 = vmatpush.msra.mxu1 %v360_v1 }
  0x28   :  { %390 = vmatpush.msra.mxu1 %v359_v2 }
  0x29   :  { %352 = vmatpush.bf16.msra.mxu0 %v539_v49 }
  0x8b   :  { %v91_v33 = vpop.f32.mrf.mxu1 }
  0x8c   :  { %v92_v34 = vadd.f32 %v91_v33, %v54_v32 }
  0x8e   :  { %v111_v35 = vmax.f32 %v92_v34, 0.0 }
  0x90   :  { %v113_v36 = vpack.c.bf16 %v111_v35, %v111_v35 }
  0x92   :  { %255 = vmatmul.bf16.vlgmr.msra.gmra.mxu2 %v113_v36 }
  0x93   :  { %v93_v37 = vpop.f32.mrf.mxu1 }
  0x9b   :  { %v104_v39 = vpop.f32.mrf.mxu1 }
  0x9c   :  { %v105_v40 = vadd.f32 %v104_v39, %v55_v38 }
  0x9e   :  { %v112_v41 = vmax.f32 %v105_v40, 0.0 }
  0xa0   :  { %v114_v42 = vpack.c.bf16 %v112_v41, %v112_v41 }
  0xa2   :  { %268 = vmatmul.bf16.vlgmr.msra.gmra.mxu3 %v114_v42 }
  0xa3   :  { %v106_v43 = vpop.f32.mrf.mxu1 }
 0x115   :  { %v256_v55 = vpop.f32.mrf.mxu2 }
 0x116   :  { %v257_v59 = vadd.f32 %v548_v58, %v256_v55 }
 0x11d   :  { %v258_v57 = vpop.f32.mrf.mxu2 }
 0x125   :  { %v269_v60 = vpop.f32.mrf.mxu3 }
 0x126   :  { %v270_v61 = vadd.f32 %v269_v60, %v257_v59 }
 0x128   :  { %v275_v62 = vmax.f32 %v270_v61, 0.0 }
 0x12a   :  { %v276_v63 = vpack.c.bf16 %v275_v62, %v275_v62 }
 0x12c   :  { %353 = vmatmul.bf16.vlgmr.msra.gmra.mxu0 %v276_v63 }
 0x12d   :  { %v271_v0 = vpop.f32.mrf.mxu3 }
 0x1a9   :  { %v354_v4 = vpop.f32.mrf.mxu0 }
 0x1aa   :  { %v355_v5 = vadd.f32 %v549_v3, %v354_v4 }
 0x1ac   :  { %v358_v6 = vmax.f32 %v355_v5, 0.0 }
 0x1ae   :  { %518 = vmatmul.msk.f32.vlgmr.msra.gmra.mxu1 %vm371_vm1, %v358_v6 }
 0x1b1   :  { %v356_v7 = vpop.f32.mrf.mxu0 }
 0x22b   :  { %v392_v9 = vpop.f32.mrf.mxu1 }
 0x22c   :  { %v393_v10 = vadd.f32 %v550_v8, %v392_v9 }
 0x22e   :  { %551 = vtanh.f32 %v393_v10 }
 0x234   :  { %v552_v11 = vpop.eup %551 }
 0x235   :  { %v396_v12 = vmul.f32 2.0, %v552_v11 }
 0x237   :  { %398 = vst.msk [vmem:[%s777_s9] sm:$0xff] %vm397_vm2, %v396_v12 }
 0x238   :  { %403 = vsyncpa [#allocation3], 1 }

</bundles_post_ra>
